<compile_context>
chip_gen: v7x
topology: tpu7x:2x2x1
jax: 0.10.0
libtpu: 0.0.40
codegen_flags: <defaults>
</compile_context>

<pallas_src>
import functools

import jax
import jax.numpy as jnp
from jax.experimental import pallas as pl
from jax.experimental.pallas import tpu as pltpu


# ------------------------------------------------------------------ helpers

def _int_pow(x, n):
    """x ** n for static integer n >= 1 via exponentiation-by-squaring.

    Pure VPU multiplies — no EUP transcendentals per element.
    """
    assert n >= 1
    result = None
    base = x
    while n > 0:
        if n & 1:
            result = base if result is None else result * base
        n >>= 1
        if n:
            base = base * base
    return result


def _static_scalar(p):
    """Return p as a concrete Python float if known at trace time, else None."""
    if isinstance(p, (int, float)):
        return float(p)
    try:
        return float(jnp.asarray(p).reshape(-1)[0])
    except Exception:  # traced under jit -> fall back to runtime-p kernel
        return None


def _choose_channel_tile(C, HW, itemsize, n_batch,
                         max_block_bytes=2 << 20, min_steps=8):
    """Pick a channel tile CT (divisor of C) such that:
       - the (CT, HW) input block stays under ~2 MiB (fits v7x VMEM budget
         with double buffering; comfortably fits v6e/v5e),
       - CT is a multiple of 8 (sublane tiling) or equals C,
       - when possible the grid has >= min_steps steps so BlockSpec
         double-buffering has slack to hide the HBM DMA even for small N.
    """
    row_bytes = HW * itemsize
    cands = [C] + [d for d in range(8, C, 8) if C % d == 0]
    fits = [d for d in cands if d * row_bytes <= max_block_bytes]
    if not fits:
        # Even the smallest legal channel tile blows the target; take it
        # anyway (only happens for enormous spatial maps).
        return min(cands, key=lambda d: d * row_bytes)
    enough = [d for d in fits if n_batch * (C // d) >= min_steps]
    return max(enough) if enough else max(fits)


# ------------------------------------------------------------------ kernels

def _gem_kernel_static(x_ref, o_ref, *, p_int, eps, clamp, inv_hw):
    # x_ref: VMEM (1, CT, HW) ;  o_ref: VMEM (1, CT, 1)
    x = x_ref[...].astype(jnp.float32)
    if clamp:
        x = jnp.maximum(x, eps)
    xp = _int_pow(x, p_int)                       # VPU multiply chain
    m = jnp.sum(xp, axis=-1) * inv_hw             # (1, CT) mean over H*W
    if p_int == 1:
        out = m
    elif p_int == 2:
        out = jnp.sqrt(m)
    else:
        out = jnp.exp(jnp.log(m) * (1.0 / p_int))  # root over CT elems only
    o_ref[...] = out[..., None].astype(o_ref.dtype)


def _gem_kernel_dynamic(p_ref, x_ref, o_ref, *, eps, clamp, inv_hw):
    # p_ref: SMEM (1,) f32 ;  x_ref: VMEM (1, CT, HW) ;  o_ref: VMEM (1, CT, 1)
    p = p_ref[0]
    inv_p = 1.0 / p                               # one scalar recip per step
    x = x_ref[...].astype(jnp.float32)
    if clamp:
        x = jnp.maximum(x, eps)
    # x > 0 after clamp; with clamp=False and x <= 0 this is NaN, matching
    # float-exponent pow semantics of the reference.
    xp = jnp.exp(p * jnp.log(x))
    m = jnp.sum(xp, axis=-1) * inv_hw             # (1, CT)
    out = jnp.exp(jnp.log(m) * inv_p)
    o_ref[...] = out[..., None].astype(o_ref.dtype)


# ------------------------------------------------------------------ wrapper

def gem_pool(x, p, eps=1e-6, clamp=True):
    """GeM pooling forward.

    Args:
      x: (N, C, H, W) array (NCHW).
      p: scalar / (1,) array, the GeM exponent (p >= 1).
    Returns:
      (N, C) array, same dtype as x.
    """
    N, C, H, W = x.shape
    HW = H * W
    x3 = x.reshape(N, C, HW)

    CT = _choose_channel_tile(C, HW, jnp.dtype(x3.dtype).itemsize, N)
    grid = (N, C // CT)

    x_spec = pl.BlockSpec((1, CT, HW), lambda i, j: (i, j, 0))
    # (N, C, 1) output: last dim (1) is full-extent, CT only needs to be a
    # multiple of 8 or == C.  Output traffic is HW-times smaller than input,
    # so the narrow store is negligible.
    out_spec = pl.BlockSpec((1, CT, 1), lambda i, j: (i, j, 0))
    out_shape = jax.ShapeDtypeStruct((N, C, 1), x.dtype)
    cparams = pltpu.CompilerParams(
        dimension_semantics=("parallel", "parallel"))
    # Note: with ~2 MiB blocks the default scoped VMEM limit is ample; a
    # pipeline_mode=pl.Buffered(3) sweep on x_spec is a further few-% option.

    p_static = _static_scalar(p)
    if (p_static is not None and p_static == round(p_static)
            and 1 <= p_static <= 16):
        kernel = functools.partial(
            _gem_kernel_static, p_int=int(round(p_static)), eps=float(eps),
            clamp=bool(clamp), inv_hw=1.0 / float(HW))
        out = pl.pallas_call(
            kernel,
            out_shape=out_shape,
            grid_spec=pltpu.PrefetchScalarGridSpec(
                num_scalar_prefetch=0, grid=grid,
                in_specs=[x_spec], out_specs=out_spec),
            compiler_params=cparams,
        )(x3)
    else:
        kernel = functools.partial(
            _gem_kernel_dynamic, eps=float(eps), clamp=bool(clamp),
            inv_hw=1.0 / float(HW))
        out = pl.pallas_call(
            kernel,
            out_shape=out_shape,
            grid_spec=pltpu.PrefetchScalarGridSpec(
                num_scalar_prefetch=0, grid=grid,
                in_specs=[pl.BlockSpec(memory_space=pltpu.SMEM), x_spec],
                out_specs=out_spec),
            compiler_params=cparams,
        )(jnp.asarray(p, jnp.float32).reshape(1), x3)

    return out.reshape(N, C)


def generalized_mean_pooling(inputs, p, eps=1e-6, clamp=True):
    """Mirrors GeneralizedMeanPooling.forward (tuple or single tensor)."""
    if isinstance(inputs, tuple):
        return tuple(gem_pool(xi, p, eps=eps, clamp=clamp) for xi in inputs)
    return gem_pool(inputs, p, eps=eps, clamp=clamp)


def gem_ref(x, p, eps=1e-6, clamp=True):
    """Pure-JAX reference matching the PyTorch implementation."""
    xf = x.astype(jnp.float32)
    if clamp:
        xf = jnp.maximum(xf, eps)
    pooled = jnp.mean(xf ** p, axis=(-2, -1))       # (N, C)
    return (pooled ** (1.0 / p)).astype(x.dtype)


if __name__ == "__main__":
    key = jax.random.PRNGKey(0)
    N, C, H, W = 2, 4, 16, 16
    x = jax.random.uniform(key, (N, C, H, W), dtype=jnp.float32)

    # nn.Parameter(torch.ones(1) * p) with p = 3.0
    p_param = jnp.ones((1,), dtype=jnp.float32) * 3.0

    # Integer-p fast path (p concrete at trace time).
    out = gem_pool(x, p_param, eps=1e-6, clamp=True)
    out = jax.block_until_ready(out)

    # Runtime-p path (p traced under jit -> SMEM exponent + exp/log math).
    out_dyn = jax.jit(lambda a, b: gem_pool(a, b, eps=1e-6, clamp=True))(
        x, p_param)
    out_dyn = jax.block_until_ready(out_dyn)

    ref = gem_ref(x, 3.0, eps=1e-6, clamp=True)
    assert out.shape == (N, C), out.shape
    assert out_dyn.shape == (N, C), out_dyn.shape
    assert jnp.allclose(out, ref, rtol=1e-4, atol=1e-5), (out, ref)
    assert jnp.allclose(out_dyn, ref, rtol=1e-4, atol=1e-5), (out_dyn, ref)

    # Tuple-input behaviour of the neck (per-scale pooling).
    outs = generalized_mean_pooling((x, x * 0.5 + 0.25), p_param)
    assert isinstance(outs, tuple) and outs[0].shape == (N, C)
    jax.block_until_ready(outs)

    print("KERNEL_OK")
</pallas_src>

<mosaic_0001>
module attributes {stable_mosaic.version = 11 : i64} {
  func.func @_gem_kernel_static(%arg0: i32, %arg1: i32, %arg2: memref<1x4x256xf32, #tpu.memory_space<vmem>>, %arg3: memref<1x4x1xf32, #tpu.memory_space<vmem>>) attributes {dimension_semantics = [#tpu.dimension_semantics<parallel>, #tpu.dimension_semantics<parallel>], iteration_bounds = array<i64: 2, 1>, scalar_prefetch = 0 : i64, scratch_operands = 0 : i64, tpu.core_type = #tpu.core_type<tc>, window_params = [{transform_indices = @transform_0, window_bounds = array<i64: 1, 4, 256>}, {transform_indices = @transform_1, window_bounds = array<i64: 1, 4, 1>}]} {
    %c0 = arith.constant 0 : index
    %c0_0 = arith.constant 0 : index
    %c0_1 = arith.constant 0 : index
    %0 = vector.load %arg2[%c0, %c0_0, %c0_1] : memref<1x4x256xf32, #tpu.memory_space<vmem>>, vector<1x4x256xf32>
    %cst = arith.constant 9.99999997E-7 : f32
    %1 = vector.broadcast %cst : f32 to vector<1x4x256xf32>
    %2 = arith.maximumf %0, %1 : vector<1x4x256xf32>
    %3 = arith.mulf %2, %2 : vector<1x4x256xf32>
    %4 = arith.mulf %2, %3 : vector<1x4x256xf32>
    %cst_2 = arith.constant dense<0.000000e+00> : vector<1x4xf32>
    %5 = vector.multi_reduction <add>, %4, %cst_2 [2] : vector<1x4x256xf32> to vector<1x4xf32>
    %cst_3 = arith.constant 3.906250e-03 : f32
    %6 = vector.broadcast %cst_3 : f32 to vector<1x4xf32>
    %7 = arith.mulf %5, %6 : vector<1x4xf32>
    %8 = math.log %7 : vector<1x4xf32>
    %cst_4 = arith.constant 0.333333343 : f32
    %9 = vector.broadcast %cst_4 : f32 to vector<1x4xf32>
    %10 = arith.mulf %8, %9 : vector<1x4xf32>
    %11 = math.exp %10 : vector<1x4xf32>
    %12 = vector.shape_cast %11 : vector<1x4xf32> to vector<1x4x1xf32>
    %c0_5 = arith.constant 0 : index
    %c0_6 = arith.constant 0 : index
    %c0_7 = arith.constant 0 : index
    %13 = vector.load %arg3[%c0_5, %c0_6, %c0_7] : memref<1x4x1xf32, #tpu.memory_space<vmem>>, vector<1x4x1xf32>
    tpu.vector_store %arg3[%c0_5, %c0_6, %c0_7], %12 {strides = array<i32>} : memref<1x4x1xf32, #tpu.memory_space<vmem>>, vector<1x4x1xf32>,
    return
  }
  func.func @transform_0(%arg0: i32, %arg1: i32) -> (i32, i32, i32) {
    %c0_i32 = arith.constant 0 : i32
    %c0_i32_0 = arith.constant 0 : i32
    return %arg0, %arg1, %c0_i32 : i32, i32, i32
  }
  func.func @transform_1(%arg0: i32, %arg1: i32) -> (i32, i32, i32) {
    %c0_i32 = arith.constant 0 : i32
    %c0_i32_0 = arith.constant 0 : i32
    return %arg0, %arg1, %c0_i32 : i32, i32, i32
  }
}

</mosaic_0001>

<bundles_post_ra>
// kernel: tpu_custom_call.1
= control target key start
LH: loop header
LB: loop body
LE: loop exit
PB: predicated region body
PF: predicated region fallthrough
CT: control target
= control target key end

     0   :  { %6 = vsyncpa [#allocation3], 0  ;;  %s554_s0 = inlined_call_operand.hbm [shape: f32[2,4,256], index: 0, kind: input, shape index: {}]   ;;  %s555_s1 = inlined_call_operand.vmem [shape: f32[2,4,1], index: 1, kind: output, shape index: {}]  }
   0x1   :  { %8 = vsyncpa [#allocation3 + $0x1], 0  ;;  %s429_s6 = smov 0   ;;  %s431_s7 = smov 0  }
   0x2   :  { %s433_s8 = smov 0   ;;  %s435_s9 = smov 0  }
   0x3   :  { %s437_s10 = smov 0   ;;  %s439_s11 = smov 0  }
   0x4 LB: > { %s264_s12 = sadd.s32 4294967295, %s416_s11   ;;  %s26_s13 = sadd.s32 1, %s412_s10  ;;  %s416_s11 = sphi %s439_s11, %s14_s11   ;;  %s412_s10 = sphi %s437_s10, %s565_s10   ;;  %s408_s9 = sphi %s435_s9, %s564_s9   ;;  %s404_s8 = sphi %s433_s8, %s563_s8   ;;  %s400_s7 = sphi %s431_s7, %s562_s7   ;;  %s396_s6 = sphi %s429_s6, %s561_s6  }
   0x5   : > { %p28_p0 = scmp.ge.s32.totalorder %s26_s13, 2  ;;  %s35_s14 = sadd.s32 1, %s404_s8 }
   0x6   : > { %p42_p1 = scmp.ne.s32.totalorder %s404_s8, %s400_s7  ;;  %p43_p2 = scmp.eq.s32.totalorder %s416_s11, 0 }
   0x7   : > { %s567_s13 = smov (%p28_p0, %s26_s13), 0  ;;  %p48_p4 = scmp.ne.s32.totalorder %s400_s7, %s396_s6 }
   0x8   : > { %p465_p3 = por %p43_p2, %p42_p1  ;;  %s30_s16 = ssub.s32 %s412_s10, %s567_s13 }
   0x9   : > { %p49_p5 = scmp.eq.s32.totalorder %s264_s12, 0  ;;  %p33_p6 = scmp.eq.s32.totalorder %s30_s16, 0 }
   0xa   : > { %p283_p8 = scmp.lt.s32.totalorder %s416_s11, 2  ;;  %s100_s19 = sand.u32 1, %s404_s8  }
   0xb   : > { %p472_p7 = por %p49_p5, %p48_p4  ;;  %s276_s20 = sshll.u32 %s412_s10, 7 }
   0xc   : > { %s478_s18 = scalar_select %p33_p6, %s404_s8, %s35_s14  }
   0xd   : > { %s268_s21 = sshll.u32 %s100_s19, 3  ;;  %s485_s24 = scalar_lea.hbm %s554_s0, %s276_s20 }
   0xe   : > { %s104_s25 = scalar_lea.vmem [#allocation2], %s268_s21  ;;  %p489_p9 = pnand %p283_p8, %p465_p3 }
   0xf   : > { %s114_s26 = sshll.u32 %s104_s25, 4  ;;  %s101_s28 = scalar_lea.sflag [#allocation3], %s100_s19  ;;  %s493_s26 = int_to_ptr.vmem [resolvable:$true] %s114_s26 }
  0x10   : > { %s336_s29 = scalar_lea.hbm %s485_s24, 128  ;;  %p338_p13 = pneg %p489_p9 }
  0x11   : > { %p337_p12 = scmp.ne.s32.totalorder %s485_s24, %s336_s29  ;;  %s341_s3 = scalar_lea.hbm %s554_s0, 256 }
  0x12   : > { %p342_p2 = scmp.lt.u32.totalorder %s485_s24, %s554_s0  ;;  %p343_p3 = scmp.lt.u32.totalorder %s341_s3, %s336_s29 }
  0x13   : > { %p339_p0 = pnand %p338_p13, %p337_p12  ;;  %p345_p5 = scmp.lt.u32.totalorder %s336_s29, %s485_s24 }
  0x14   : > { %p344_p4 = por %p343_p3, %p342_p2 }
  0x15   : > { %p340_p1 = pneg %p339_p0 }
  0x16   : > { %p346_p6 = por %p345_p5, %p344_p4 }
  0x18   : > { %p347_p8 = pnand %p346_p6, %p340_p1 }
  0x1a   : > { %350 = shalt.err (!%p347_p8)
}
  0x1b   : > { %s351_s6 = scalar_lea.vmem %s493_s26, 128  ;;  %s418_s12 = smov [#allocation2]  }
  0x1c   : > { %p352_p12 = scmp.ne.s32.totalorder %s493_s26, %s351_s6  ;;  %s356_s14 = sshll.u32 %s418_s12, 4  ;;  %s357_s14 = int_to_ptr.vmem [resolvable:$false] %s356_s14 }
  0x1d   : > { %s358_s15 = scalar_lea.vmem %s357_s14, 256  ;;  %p359_p11 = scmp.lt.s32.totalorder %s493_s26, %s357_s14 }
  0x1e   : > { %p354_p0 = pnand %p352_p12, %p338_p13  ;;  %p360_p2 = scmp.lt.s32.totalorder %s358_s15, %s351_s6 }
  0x20   : > { %p355_p10 = pneg %p354_p0  ;;  %p361_p3 = por %p360_p2, %p359_p11 }
  0x22   : > { %p362_p4 = pnand %p361_p3, %p355_p10 }
  0x24   : > { %365 = shalt.err (!%p362_p4)
}
  0x25   : > { %282 = dma.hbm_to_vmem [thread:$0]  (!%p489_p9), %s485_s24, 128, %s493_s26, %s101_s28  }
  0x26   : > { %p559_p1 = scmp.lt.s32.totalorder %s416_s11, 3  ;;  %p560_p5 = scmp.ge.s32.totalorder %s416_s11, 1 }
  0x28   : > { %p120_p13 = pnand %p560_p5, %p559_p1 }
  0x29   : > { %s125_s16 = sand.u32 (!%p120_p13), 1, %s400_s7  }
  0x2a   : > { %123 = sbr.rel (%p120_p13) target bundleno = 235 (0xeb), region = 24  ;;  %s272_s19 = sshll.u32 (!%p120_p13), %s125_s16, 3 }
  0x2b   : > { %s126_s20 = scalar_lea.sflag (!%p120_p13), [#allocation3], %s125_s16  ;;  %s129_s21 = scalar_lea.vmem (!%p120_p13), [#allocation2], %s272_s19 }
  0x31   : > { %391 = dma.done.wait (%p472_p7), %s126_s20, 128  }
  0x32   : > { %393 = vsyncadd (%p472_p7), %s126_s20, 4294967168  ;;  %v157_v0 = vld [vmem:[%s129_s21] sm:$0xff]  ;;  %vm164_vm0 = vcmask 1043456   ;;  %p150_p9 = scmp.lt.s32.totalorder %s408_s9, 1  ;;  %vm176_vm1 = vcmask 3072  }
  0x33   : > { %v158_v1 = vmax.f32 %v157_v0, 1e-06 }
  0x34   : > { %s569_s9 = smov (!%p150_p9, %s408_s9), 1 }
  0x35   : > { %v159_v2 = vmul.f32 %v158_v1, %v158_v1  ;;  %s273_s17 = sshll.u32 %s569_s9, 2 }
  0x36   : > { %s156_s24 = scalar_lea.vmem %s555_s1, %s273_s17 }
  0x37   : > { %v160_v3 = vmul.f32 %v159_v2, %v158_v1 }
  0x39   : > { %v162_v4 = vcombine.high %v160_v3, %v160_v3  ;;  %v165_v5 = vsel %vm164_vm0, %v160_v3, 0.0 }
  0x3b   : > { %v166_v6 = vsel %vm164_vm0, %v162_v4, 0.0 }
  0x3c   : > { %v167_v7 = vadd.f32 %v166_v6, %v165_v5 }
  0x3e   : > { %168 = vadd.xlane.f32.xlu0 %v167_v7 }
  0xcb   : > { %v169_v8 = vpop.xlane.xlu0 %168 }
  0xcc   : > { %v170_v9 = vmul.f32 0.00390625, %v169_v8 }
  0xce   : > { %332 = vlog2.f32 %v170_v9 }
  0xd8   : > { %v333_v10 = vpop.eup %332 }
  0xd9   : > { %v172_v11 = vmul.f32 0.6931472, %v333_v10 }
  0xdb   : > { %v173_v12 = vmul.f32 0.33333334, %v172_v11 }
  0xdd   : > { %v174_v13 = vmul.f32 1.442695, %v173_v12 }
  0xdf   : > { %334 = vpow2.f32 %v174_v13 }
  0xe9   : > { %v335_v14 = vpop.eup %334 }
  0xea   : > { %177 = vst.msk [vmem:[%s156_s24] sm:$0xf] %vm176_vm1, %v335_v14 }
  0xeb PF: > { %s14_s11 = sadd.s32 1, %s416_s11   ;;  %s561_s6 = smov %s400_s7 }
  0xec   : > { %p11_p7 = scmp.ge.s32.totalorder %s14_s11, 4   ;;  %s562_s7 = smov %s404_s8 }
  0xed   : > { %s563_s8 = smov %s478_s18  ;;  %s564_s9 = smov %s412_s10 }
  0xee   : > { %s565_s10 = smov %s567_s13  ;;  %13 = sbr.rel (!%p11_p7) target bundleno = 4 (0x4), region = 64 }
  0xf5   :  { %203 = vsyncpa [#allocation3], 1 }
  0xf6   :  { %205 = vsyncpa [#allocation3 + $0x1], 1 }

</bundles_post_ra>
